<compile_context>
chip_gen: v7x
topology: tpu7x:2x2x1
jax: 0.10.0
libtpu: 0.0.40
codegen_flags: <defaults>
</compile_context>

<pallas_src>
import functools

import jax
import jax.numpy as jnp
from jax.experimental import pallas as pl
from jax.experimental.pallas import tpu as pltpu


def _round_up(x, m):
    return ((x + m - 1) // m) * m


def _focal_loss_kernel(logits_ref, targets_ref, out_ref, *,
                       alpha_over_n, gamma, n_valid, tm):
    i = pl.program_id(0)

    x = logits_ref[...]                                    # (TM, C), input dtype
    t = targets_ref[...]                                   # (TM, 1), int32

    # Target one-hot mask (no dynamic gather on TPU).
    col = jax.lax.broadcasted_iota(jnp.int32, x.shape, 1)
    onehot = col == t                                      # (TM, C) bool

    # Three cross-lane reductions total: row max, target-logit gather, sum-exp.
    # max / select are exact in the input dtype (halves vreg pressure for bf16).
    m = jnp.max(x, axis=-1, keepdims=True)                 # (TM, 1)
    t_logit = jnp.sum(jnp.where(onehot, x, jnp.zeros_like(x)),
                      axis=-1, keepdims=True)              # (TM, 1)

    shifted = (x - m).astype(jnp.float32)                  # (TM, C) f32
    sum_e = jnp.sum(jnp.exp(shifted), axis=-1, keepdims=True)   # (TM, 1)

    # Exact per-sample cross entropy; pt = exp(-ce) on the (TM, 1) vector.
    ce = jnp.log(sum_e) - (t_logit.astype(jnp.float32) - m.astype(jnp.float32))
    pt = jnp.exp(-ce)
    one_minus_pt = jnp.maximum(1.0 - pt, 0.0)

    # (1 - pt) ** gamma: integer gamma -> exact repeated multiplies (VPU only).
    g = float(gamma)
    if g == 0.0:
        w = jnp.ones_like(one_minus_pt)
    elif g.is_integer() and 0 < g <= 8:
        w = one_minus_pt
        for _ in range(int(g) - 1):
            w = w * one_minus_pt
    else:
        # Non-integer gamma: clamp to avoid log(0) -> 0 * inf at pt == 1.
        w = jnp.exp(g * jnp.log(jnp.maximum(one_minus_pt, 1e-12)))

    loss = w * ce                                          # (TM, 1)

    # Mask rows past the true batch size: the overhanging last tile reads
    # unspecified data and this select discards it (including NaN/inf).
    row = jax.lax.broadcasted_iota(jnp.int32, loss.shape, 0) + i * tm
    loss = jnp.where(row < n_valid, loss, 0.0)

    # alpha and 1/N folded into a single scale; lane-dense unmasked store of
    # the per-tile partial sum (wrapper reads element [0, 0]).
    part = alpha_over_n * jnp.sum(loss)
    out_ref[...] = jnp.full(out_ref.shape, part, dtype=jnp.float32)


def focal_loss(logits, targets, alpha=0.25, gamma=2.0, tile_rows=None):
    """logits: (N, C) float32/bf16, targets: (N,) int. Returns scalar f32."""
    n, c = logits.shape
    itemsize = jnp.dtype(logits.dtype).itemsize
    c_lanes = _round_up(c, 128)          # lane-padded width of a VMEM row

    # VMEM capacity per TensorCore; fall back to v7x's 64 MiB if unknown.
    try:
        vmem_cap = int(pltpu.get_tpu_info().vmem_capacity_bytes)
    except Exception:
        vmem_cap = 64 * 1024 * 1024
    # Leave headroom for compiler scratch / output double-buffering.
    vmem_ceiling = min(vmem_cap * 3 // 4, 96 * 1024 * 1024)
    budget = vmem_ceiling - 8 * 1024 * 1024

    # Per-row VMEM bytes: double-buffered input tile (input dtype) plus ~5
    # lane-padded f32 intermediates live in the kernel body, plus targets.
    bytes_per_row = c_lanes * (2 * itemsize + 5 * 4) + 2 * 4

    if tile_rows is None:
        tm = max(8, (budget // bytes_per_row) // 8 * 8)
        # Keep >= ~4 grid steps (v7x megacore sharding / pipelining), but never
        # shrink a tile below ~2 MiB of input (amortizes ~0.35 us/step).
        floor_rows = max(8, _round_up((2 * 1024 * 1024) // (c_lanes * itemsize), 8))
        quarter = max(8, _round_up(pl.cdiv(n, 4), 8))
        tm = min(tm, max(quarter, floor_rows))
    else:
        tm = _round_up(int(tile_rows), 8)
    tm = max(8, min(tm, _round_up(n, 8)))

    num_tiles = pl.cdiv(n, tm)
    vmem_limit = int(max(32 * 1024 * 1024,
                         min(tm * bytes_per_row + 8 * 1024 * 1024, vmem_ceiling)))

    targets_2d = targets.astype(jnp.int32).reshape(n, 1)

    kernel = functools.partial(
        _focal_loss_kernel,
        alpha_over_n=float(alpha) / float(n),
        gamma=float(gamma),
        n_valid=n,
        tm=tm,
    )

    partials = pl.pallas_call(
        kernel,
        out_shape=jax.ShapeDtypeStruct((num_tiles, 8, 128), jnp.float32),
        grid=(num_tiles,),
        in_specs=[
            pl.BlockSpec((tm, c), lambda i: (i, 0)),       # full-width class axis
            pl.BlockSpec((tm, 1), lambda i: (i, 0)),
        ],
        out_specs=pl.BlockSpec((1, 8, 128), lambda i: (i, 0, 0)),
        compiler_params=pltpu.CompilerParams(
            dimension_semantics=("parallel",),   # independent per-tile partials
            vmem_limit_bytes=vmem_limit,
        ),
    )(logits, targets_2d)

    return jnp.sum(partials[:, 0, 0])


def _focal_ref(logits, targets, alpha, gamma):
    logp = jax.nn.log_softmax(logits.astype(jnp.float32), axis=-1)
    ce = -jnp.take_along_axis(logp, targets[:, None], axis=-1)[:, 0]
    pt = jnp.exp(-ce)
    return jnp.mean(alpha * (1.0 - pt) ** gamma * ce)


if __name__ == "__main__":
    key = jax.random.PRNGKey(0)
    k1, k2, k3, k4 = jax.random.split(key, 4)

    # Case 1: ragged shapes — un-padded class axis (C=37) and a multi-tile grid
    # with an overhanging last row tile (N=20, tile_rows=8 -> grid of 3).
    N1, C1 = 20, 37
    logits1 = jax.random.normal(k1, (N1, C1), dtype=jnp.float32)
    targets1 = jax.random.randint(k2, (N1,), 0, C1, dtype=jnp.int32)
    loss1 = focal_loss(logits1, targets1, alpha=0.25, gamma=2, tile_rows=8)
    jax.block_until_ready(loss1)
    ref1 = _focal_ref(logits1, targets1, 0.25, 2.0)
    assert jnp.allclose(loss1, ref1, atol=1e-4, rtol=1e-4), (loss1, ref1)

    # Case 2: original small case, auto tile size (single tile).
    N2, C2 = 8, 32
    logits2 = jax.random.normal(k3, (N2, C2), dtype=jnp.float32)
    targets2 = jax.random.randint(k4, (N2,), 0, C2, dtype=jnp.int32)
    loss2 = focal_loss(logits2, targets2, alpha=0.25, gamma=2.0)
    jax.block_until_ready(loss2)
    ref2 = _focal_ref(logits2, targets2, 0.25, 2.0)
    assert jnp.allclose(loss2, ref2, atol=1e-4, rtol=1e-4), (loss2, ref2)

    print("KERNEL_OK")
</pallas_src>

<mosaic_0001>
module attributes {stable_mosaic.version = 11 : i64} {
  func.func @_focal_loss_kernel(%arg0: i32, %arg1: memref<8x37xf32, #tpu.memory_space<vmem>>, %arg2: memref<8x1xi32, #tpu.memory_space<vmem>>, %arg3: memref<1x8x128xf32, #tpu.memory_space<vmem>>) attributes {dimension_semantics = [#tpu.dimension_semantics<parallel>], iteration_bounds = array<i64: 3>, scalar_prefetch = 0 : i64, scratch_operands = 0 : i64, tpu.core_type = #tpu.core_type<tc>, window_params = [{transform_indices = @transform_0, window_bounds = array<i64: 8, 37>}, {transform_indices = @transform_1, window_bounds = array<i64: 8, 1>}, {transform_indices = @transform_2, window_bounds = array<i64: 1, 8, 128>}]} {
    %c0 = arith.constant 0 : index
    %c0_0 = arith.constant 0 : index
    %0 = vector.load %arg1[%c0, %c0_0] : memref<8x37xf32, #tpu.memory_space<vmem>>, vector<8x37xf32>
    %c0_1 = arith.constant 0 : index
    %c0_2 = arith.constant 0 : index
    %1 = vector.load %arg2[%c0_1, %c0_2] : memref<8x1xi32, #tpu.memory_space<vmem>>, vector<8x1xi32>
    %2 = tpu.iota {dimensions = array<i32: 1>} : vector<8x37xi32>
    %3 = vector.broadcast %1 : vector<8x1xi32> to vector<8x37xi32>
    %4 = arith.cmpi eq, %2, %3 : vector<8x37xi32>
    %cst = arith.constant dense<0xFF800000> : vector<8xf32>
    %5 = vector.multi_reduction <maximumf>, %0, %cst [1] : vector<8x37xf32> to vector<8xf32>
    %6 = vector.shape_cast %5 : vector<8xf32> to vector<8x1xf32>
    %cst_3 = arith.constant 0.000000e+00 : f32
    %7 = vector.broadcast %cst_3 : f32 to vector<8x37xf32>
    %8 = arith.select %4, %0, %7 : vector<8x37xi1>, vector<8x37xf32>
    %cst_4 = arith.constant dense<0.000000e+00> : vector<8xf32>
    %9 = vector.multi_reduction <add>, %8, %cst_4 [1] : vector<8x37xf32> to vector<8xf32>
    %10 = vector.shape_cast %9 : vector<8xf32> to vector<8x1xf32>
    %11 = vector.broadcast %6 : vector<8x1xf32> to vector<8x37xf32>
    %12 = arith.subf %0, %11 : vector<8x37xf32>
    %13 = math.exp %12 : vector<8x37xf32>
    %cst_5 = arith.constant dense<0.000000e+00> : vector<8xf32>
    %14 = vector.multi_reduction <add>, %13, %cst_5 [1] : vector<8x37xf32> to vector<8xf32>
    %15 = vector.shape_cast %14 : vector<8xf32> to vector<8x1xf32>
    %16 = math.log %15 : vector<8x1xf32>
    %17 = arith.subf %10, %6 : vector<8x1xf32>
    %18 = arith.subf %16, %17 : vector<8x1xf32>
    %cst_6 = arith.constant 0.000000e+00 : f32
    %19 = vector.broadcast %cst_6 : f32 to vector<8x1xf32>
    %20 = arith.subf %19, %18 : vector<8x1xf32>
    %21 = math.exp %20 : vector<8x1xf32>
    %cst_7 = arith.constant 1.000000e+00 : f32
    %22 = vector.broadcast %cst_7 : f32 to vector<8x1xf32>
    %23 = arith.subf %22, %21 : vector<8x1xf32>
    %cst_8 = arith.constant 0.000000e+00 : f32
    %24 = vector.broadcast %cst_8 : f32 to vector<8x1xf32>
    %25 = arith.maximumf %23, %24 : vector<8x1xf32>
    %26 = arith.mulf %25, %25 : vector<8x1xf32>
    %27 = arith.mulf %26, %18 : vector<8x1xf32>
    %28 = tpu.iota {dimensions = array<i32: 0>} : vector<8x1xi32>
    %c8_i32 = arith.constant 8 : i32
    %29 = arith.muli %arg0, %c8_i32 : i32
    %30 = vector.broadcast %29 : i32 to vector<8x1xi32>
    %31 = arith.addi %28, %30 : vector<8x1xi32>
    %c20_i32 = arith.constant 20 : i32
    %32 = vector.broadcast %c20_i32 : i32 to vector<8x1xi32>
    %33 = arith.cmpi slt, %31, %32 : vector<8x1xi32>
    %cst_9 = arith.constant 0.000000e+00 : f32
    %34 = vector.broadcast %cst_9 : f32 to vector<8x1xf32>
    %35 = arith.select %33, %27, %34 : vector<8x1xi1>, vector<8x1xf32>
    %36 = vector.shape_cast %35 : vector<8x1xf32> to vector<1x8x1xf32>
    %cst_10 = arith.constant dense<0.000000e+00> : vector<1xf32>
    %37 = vector.multi_reduction <add>, %36, %cst_10 [1, 2] : vector<1x8x1xf32> to vector<1xf32>
    %38 = vector.shape_cast %37 : vector<1xf32> to vector<1x1x1xf32>
    %39 = vector.extract %38[0, 0, 0] : f32 from vector<1x1x1xf32>
    %cst_11 = arith.constant 1.250000e-02 : f32
    %40 = arith.mulf %cst_11, %39 : f32
    %41 = vector.broadcast %40 : f32 to vector<1x8x128xf32>
    %c0_12 = arith.constant 0 : index
    %c0_13 = arith.constant 0 : index
    %c0_14 = arith.constant 0 : index
    %42 = vector.load %arg3[%c0_12, %c0_13, %c0_14] : memref<1x8x128xf32, #tpu.memory_space<vmem>>, vector<1x8x128xf32>
    tpu.vector_store %arg3[%c0_12, %c0_13, %c0_14], %41 {strides = array<i32>} : memref<1x8x128xf32, #tpu.memory_space<vmem>>, vector<1x8x128xf32>,
    return
  }
  func.func @transform_0(%arg0: i32) -> (i32, i32) {
    %c0_i32 = arith.constant 0 : i32
    %c0_i32_0 = arith.constant 0 : i32
    return %arg0, %c0_i32 : i32, i32
  }
  func.func @transform_1(%arg0: i32) -> (i32, i32) {
    %c0_i32 = arith.constant 0 : i32
    %c0_i32_0 = arith.constant 0 : i32
    return %arg0, %c0_i32 : i32, i32
  }
  func.func @transform_2(%arg0: i32) -> (i32, i32, i32) {
    %c0_i32 = arith.constant 0 : i32
    %c0_i32_0 = arith.constant 0 : i32
    %c0_i32_1 = arith.constant 0 : i32
    return %arg0, %c0_i32, %c0_i32_0 : i32, i32, i32
  }
}

</mosaic_0001>

<bundles_post_ra>
// kernel: tpu_custom_call.1
= control target key start
LH: loop header
LB: loop body
LE: loop exit
PB: predicated region body
PF: predicated region fallthrough
CT: control target
= control target key end

     0   :  { %7 = vsyncpa [#allocation3], 0  ;;  %s544_s0 = inlined_call_operand.vmem [shape: f32[20,37], index: 0, kind: input, shape index: {}]   ;;  %s545_s1 = inlined_call_operand.vmem [shape: s32[20,1], index: 1, kind: input, shape index: {}]   ;;  %s546_s2 = inlined_call_operand.hbm [shape: f32[3,8,128], index: 2, kind: output, shape index: {}]  }
   0x1   :  { %9 = vsyncpa [#allocation3 + $0x1], 0  ;;  %s437_s9 = smov 0   ;;  %s439_s10 = smov 0  }
   0x2   :  { %s441_s11 = smov 0   ;;  %s443_s12 = smov 0  }
   0x3 LB: > { %s458_s13 = sadd.s32 4294967295, %s418_s12   ;;  %s295_s14 = sadd.s32 4294967294, %s418_s12   ;;  %s418_s12 = sphi %s443_s12, %s552_s12   ;;  %s414_s11 = sphi %s441_s11, %s551_s11   ;;  %s410_s10 = sphi %s439_s10, %s550_s10   ;;  %s406_s9 = sphi %s437_s9, %s549_s9  }
   0x4   : > { %s462_s15 = sadd.s32 1, %s418_s12   ;;  %s74_s16 = sadd.s32 1, %s414_s11 }
   0x5   : > { %s71_s17 = ssub.s32 %s418_s12, %s462_s15  ;;  %p84_p0 = scmp.ne.s32.totalorder %s414_s11, %s410_s10 }
   0x6   : > { %p72_p1 = scmp.eq.s32.totalorder %s71_s17, 0  ;;  %p85_p2 = scmp.eq.s32.totalorder %s458_s13, 2 }
   0x7   : > { %p90_p3 = scmp.ne.s32.totalorder %s410_s10, %s406_s9  ;;  %p91_p4 = scmp.eq.s32.totalorder %s295_s14, 2 }
   0x8   : > { %s473_s18 = scalar_select %p72_p1, %s414_s11, %s74_s16  }
   0x9   : > { %p475_p5 = por %p85_p2, %p84_p0  ;;  %p479_p6 = por %p91_p4, %p90_p3 }
   0xa   : > { %p298_p7 = scmp.ge.s32.totalorder %s418_s12, 1  ;;  %p123_p8 = scmp.lt.s32.totalorder %s418_s12, 4 }
   0xc   : > { %p124_p9 = pnand %p298_p7, %p123_p8 }
   0xd   : > { %p148_p10 = scmp.lt.s32.totalorder (!%p124_p9), %s458_s13, 2  ;;  %v420_v0 = vmov (!%p124_p9), 0   ;;  %vm164_vm0 = vcmask (!%p124_p9), 302080   ;;  %v158_v7 = vlaneseq (!%p124_p9)  ;;  %s302_s29 = sshll.u32 (!%p124_p9), %s458_s13, 3  ;;  %vm196_vm3 = vcmask (!%p124_p9), 7168  }
   0xe   : > { %127 = sbr.rel (%p124_p9) target bundleno = 588 (0x24c), region = 28  ;;  %349 = vset.pattern.permute.xlu0 (!%p124_p9), %v420_v0  ;;  %v192_v23 = vstv (!%p124_p9), %s302_s29  ;;  %s145_s30 = sand.u32 (!%p124_p9), 1, %s410_s10  }
   0xf   : > { %v159_v8 = vand.u32 (!%p124_p9), 127, %v158_v7  ;;  %v190_v22 = vshrl.u32 (!%p124_p9), %v158_v7, 7  ;;  %s299_s3 = sshll.u32 (!%p124_p9), %s145_s30, 3  ;;  %s304_s6 = sshll.u32 (!%p124_p9), %s458_s13, 7 }
  0x10   : > { %s147_s4 = scalar_lea.vmem (!%p124_p9), [#allocation2], %s299_s3  ;;  %s502_s17 = scalar_lea.hbm (!%p124_p9), %s546_s2, %s304_s6 }
  0x11   : > { %v193_v26 = vadd.s32 (!%p124_p9), %v192_v23, %v190_v22  ;;  %s224_s5 = sshll.u32 (!%p124_p9), %s147_s4, 4  ;;  %s504_s5 = int_to_ptr.vmem [resolvable:$true] %s224_s5 }
  0x13   : > { %vm194_vm2 = vcmp.lt.s32.totalorder (!%p124_p9), %v193_v26, 20 }
  0x15   : > { %s149_s21 = scalar_select %p148_p10, %s458_s13, 2 }
  0x16   : > { %s421_s13 = smov [#allocation2]  }
  0x17   : > { %s300_s22 = sshll.u32 %s149_s21, 3  ;;  %s211_s21 = scalar_lea.sflag [#allocation3], %s145_s30 }
  0x18   : > { %s151_s25 = scalar_lea.vmem %s544_s0, %s300_s22  ;;  %s155_s28 = scalar_lea.vmem %s545_s1, %s300_s22 }
  0x19   : > { %v156_v1 = vld [vmem:[%s151_s25] sm:$0xff]  ;;  %s356_s22 = scalar_lea.vmem %s504_s5, 128  ;;  %s360_s23 = sshll.u32 %s421_s13, 4  ;;  %s361_s23 = int_to_ptr.vmem [resolvable:$false] %s360_s23 }
  0x1a   : > { %v165_v2 = vsel %vm164_vm0, %v156_v1, -inf  ;;  %v157_v3 = vld [vmem:[%s155_s28] sm:$0xff]  ;;  %p357_p11 = scmp.ne.s32.totalorder %s504_s5, %s356_s22  ;;  %s362_s24 = scalar_lea.vmem %s361_s23, 256 }
  0x1b   : > { %166 = vmax.xlane.f32.xlu0 %v165_v2  ;;  %p363_p0 = scmp.lt.s32.totalorder %s504_s5, %s361_s23  ;;  %p364_p1 = scmp.lt.s32.totalorder %s362_s24, %s356_s22 }
  0x1c   : > { %p358_p12 = pnand %p357_p11, %p475_p5 }
  0x1d   : > { %p365_p2 = por %p364_p1, %p363_p0 }
  0x1e   : > { %p359_p13 = pneg %p358_p12 }
  0x20   : > { %p366_p3 = pnand %p365_p2, %p359_p13 }
  0x31   : > { %161 = vperm.xlu0 %349, %v157_v3  }
  0xa8   : > { %v167_v4 = vpop.xlane.xlu0 %166 }
  0xa9   : > { %v172_v5 = vsub.f32 %v156_v1, %v167_v4 }
  0xab   : > { %v173_v6 = vmul.f32 1.442695, %v172_v5 }
  0xad   : > { %350 = vpow2.f32 %v173_v6 }
  0xb0   : > { %v162_v9 = vpop.permute.xlu0 %161 }
  0xb1   : > { %vm163_vm1 = vcmp.eq.s32.totalorder %v159_v8, %v162_v9 }
  0xb2   : > { %v168_v11 = vsel %vm163_vm1, %v156_v1, 0.0 }
  0xb3   : > { %v169_v13 = vsel %vm164_vm0, %v168_v11, 0.0 }
  0xb7   : > { %v351_v10 = vpop.eup %350 }
  0xb8   : > { %v175_v12 = vsel %vm164_vm0, %v351_v10, 0.0 }
  0xb9   : > { %176 = vadd.xlane.f32.xlu1 %v175_v12 }
  0xbd   : > { %170 = vadd.xlane.f32.xlu1 %v169_v13 }
 0x146   : > { %v177_v14 = vpop.xlane.xlu1 %176 }
 0x147   : > { %352 = vlog2.f32 %v177_v14 }
 0x14a   : > { %v171_v15 = vpop.xlane.xlu1 %170 }
 0x14b   : > { %v180_v18 = vsub.f32 %v171_v15, %v167_v4 }
 0x151   : > { %v353_v16 = vpop.eup %352 }
 0x152   : > { %v179_v17 = vmul.f32 0.6931472, %v353_v16 }
 0x154   : > { %v181_v19 = vsub.f32 %v179_v17, %v180_v18 }
 0x156   : > { %v182_v20 = vsub.f32 0.0, %v181_v19 }
 0x158   : > { %v183_v21 = vmul.f32 1.442695, %v182_v20 }
 0x15a   : > { %354 = vpow2.f32 %v183_v21 }
 0x164   : > { %v355_v24 = vpop.eup %354 }
 0x165   : > { %v185_v25 = vsub.f32 1.0, %v355_v24 }
 0x167   : > { %v186_v27 = vmax.f32 %v185_v25, 0.0 }
 0x169   : > { %v187_v28 = vmul.f32 %v186_v27, %v186_v27 }
 0x16b   : > { %v188_v29 = vmul.f32 %v187_v28, %v181_v19 }
 0x16d   : > { %v195_v30 = vsel %vm194_vm2, %v188_v29, 0.0 }
 0x16e   : > { %v197_v31 = vsel %vm196_vm3, %v195_v30, 0.0 }
 0x16f   : > { %198 = vadd.xlane.f32.xlu1 %v197_v31 }
 0x1fc   : > { %v199_v32 = vpop.xlane.xlu1 %198 }
 0x1fd   : > { %v200_v33 = vrot.slane %v199_v32, 4 }
 0x1ff   : > { %v201_v34 = vadd.f32 %v200_v33, %v199_v32 }
 0x201   : > { %v202_v35 = vrot.slane %v201_v34, 2 }
 0x203   : > { %v203_v36 = vadd.f32 %v202_v35, %v201_v34 }
 0x205   : > { %v204_v37 = vrot.slane %v203_v36, 1 }
 0x207   : > { %v205_v38 = vadd.f32 %v204_v37, %v203_v36 }
 0x209   : > { %307 = vpush %v205_v38 }
 0x23a   : > { %s308_s7 = spop %307 }
 0x23b   : > { %s207_s8 = smul.f32 0.0125, %s308_s7 }
 0x23d   : > { %v208_v39 = vstv %s207_s8 }
 0x23e   : > { %209 = vst [vmem:[%s147_s4] sm:$0xff] %v208_v39 }
 0x23f   : > { %369 = shalt.err (!%p366_p3)
}
 0x240   : > { %s370_s25 = scalar_lea.hbm %s502_s17, 128  ;;  %s374_s28 = scalar_lea.hbm %s546_s2, 384 }
 0x241   : > { %p371_p4 = scmp.ne.s32.totalorder %s502_s17, %s370_s25  ;;  %p375_p9 = scmp.lt.u32.totalorder %s502_s17, %s546_s2 }
 0x242   : > { %p376_p10 = scmp.lt.u32.totalorder %s374_s28, %s370_s25  ;;  %p378_p12 = scmp.lt.u32.totalorder %s370_s25, %s502_s17 }
 0x243   : > { %p372_p7 = pnand %p371_p4, %p475_p5 }
 0x244   : > { %p377_p11 = por %p376_p10, %p375_p9 }
 0x245   : > { %p373_p8 = pneg %p372_p7 }
 0x246   : > { %p379_p13 = por %p378_p12, %p377_p11 }
 0x248   : > { %p380_p0 = pnand %p379_p13, %p373_p8 }
 0x24a   : > { %383 = shalt.err (!%p380_p0)
}
 0x24b   : > { %309 = dma.vmem_to_hbm [thread:$0]  (%p475_p5), %s504_s5, 128, %s502_s17, %s211_s21  }
 0x24c PF: > { %p315_p1 = scmp.ge.s32.totalorder %s418_s12, 2  ;;  %s236_s3 = sand.u32 1, %s406_s9  }
 0x24d   : > { %s237_s4 = scalar_lea.sflag [#allocation3], %s236_s3 }
 0x24e   : > { %p312_p2 = pnand %p315_p1, %p479_p6 }
 0x250   : > { %401 = dma.done.wait (!%p312_p2), %s237_s4, 128  }
 0x251   : > { %403 = vsyncadd (!%p312_p2), %s237_s4, 4294967168  ;;  %p12_p3 = scmp.ge.s32.totalorder %s462_s15, 5   ;;  %s549_s9 = smov %s410_s10 }
 0x252   : > { %s550_s10 = smov %s414_s11  ;;  %s551_s11 = smov %s473_s18 }
 0x253   : > { %s552_s12 = smov %s462_s15  ;;  %14 = sbr.rel (!%p12_p3) target bundleno = 3 (0x3), region = 66 }
 0x25a   :  { %242 = vsyncpa [#allocation3], 1 }
 0x25b   :  { %244 = vsyncpa [#allocation3 + $0x1], 1 }

</bundles_post_ra>
